<compile_context>
chip_gen: v7x
topology: tpu7x:2x2x1
jax: 0.10.0
libtpu: 0.0.40
codegen_flags: <defaults>
</compile_context>

<pallas_src>
import jax
import jax.numpy as jnp
from jax.experimental import pallas as pl
from jax.experimental.pallas import tpu as pltpu

_LANES = 128
_CHUNK_MAX = 64  # rows per inner-loop chunk == accumulator rows


def _round_up(a, b):
    return -(-a // b) * b


def _make_mse_kernel(rows_valid, chunk):
    """Build the kernel with the (static) valid-row count and chunk size baked in."""

    def kernel(pred_ref, tgt_ref, out_ref):
        c = pl.program_id(0)
        i = pl.program_id(1)
        steps = pl.num_programs(1)
        rt = pred_ref.shape[0]
        n_chunks = rt // chunk

        # Output block is resident across the i (reduction) axis: init once.
        @pl.when(i == 0)
        def _():
            out_ref[...] = jnp.zeros(out_ref.shape, out_ref.dtype)

        # Logical first row of this grid step.  Grid steps whose input block
        # index was clamped in the index_map have row0 >= rows_valid and are
        # fully masked, so they contribute exactly zero.
        row0 = (c * steps + i) * rt
        row_iota = jax.lax.broadcasted_iota(jnp.int32, (chunk, _LANES), 0)

        def body(j, acc):
            r = pl.multiple_of(j * chunk, chunk)
            p = pred_ref[pl.ds(r, chunk), :].astype(jnp.float32)
            t = tgt_ref[pl.ds(r, chunk), :].astype(jnp.float32)
            d = p - t
            valid = (row_iota + (row0 + r)) < rows_valid
            return acc + jnp.where(valid, d * d, 0.0)

        acc = jax.lax.fori_loop(
            0, n_chunks, body,
            jnp.zeros((chunk, _LANES), jnp.float32),
            unroll=min(8, n_chunks),
        )
        out_ref[...] += acc[None]

    return kernel


def joint_loss(pred, target, *, block_bytes=2 * 1024 * 1024, n_split=2):
    """Equivalent of JointLoss.forward(pred, target) == nn.MSELoss()(pred, target)."""
    assert pred.shape == target.shape, (pred.shape, target.shape)
    assert pred.dtype == target.dtype, (pred.dtype, target.dtype)
    n_elems = int(pred.size)
    assert n_elems > 0
    assert n_split >= 1

    itemsize = jnp.dtype(pred.dtype).itemsize
    sub_min = 8 * max(1, 4 // itemsize)  # f32: 8 sublanes, bf16: 16, int8/fp8: 32

    pred_f = pred.reshape(-1)
    tgt_f = target.reshape(-1)

    # Lane alignment only: pad with <=127 zeros iff n_elems % 128 != 0 (zeros
    # add 0 to the sum of squared diffs).  This is the only wrapper-side copy;
    # every other ragged case is handled by in-kernel masking.
    rem = n_elems % _LANES
    if rem:
        pred_f = jnp.pad(pred_f, (0, _LANES - rem))
        tgt_f = jnp.pad(tgt_f, (0, _LANES - rem))
    rows = pred_f.size // _LANES
    pred2d = pred_f.reshape(rows, _LANES)  # contiguous, lane-dense view
    tgt2d = tgt_f.reshape(rows, _LANES)

    # Row-tile sizing: ~block_bytes per input block (scaled by dtype width) so
    # DMA time per step dwarfs the fixed per-step overhead; shrink for small
    # problems so each split gets roughly one block.
    if rows <= _CHUNK_MAX:
        chunk = rows
        rt = rows
    else:
        desired = max(_CHUNK_MAX, block_bytes // (_LANES * itemsize))
        rt = min(desired, _round_up(pl.cdiv(rows, n_split), sub_min))
        chunk = min(_CHUNK_MAX, rt)
        rt = _round_up(rt, chunk)

    total_blocks = pl.cdiv(rows, rt)
    steps = pl.cdiv(total_blocks, n_split)
    last_block = total_blocks - 1

    def in_map(c, i):
        # Clamp so trailing grid steps never ask for a fully out-of-bounds
        # block; the kernel masks their contribution to zero.
        return (jnp.minimum(c * steps + i, last_block), 0)

    partials = pl.pallas_call(
        _make_mse_kernel(rows, chunk),
        out_shape=jax.ShapeDtypeStruct((n_split, chunk, _LANES), jnp.float32),
        grid_spec=pltpu.PrefetchScalarGridSpec(
            num_scalar_prefetch=0,
            grid=(n_split, steps),
            in_specs=[
                pl.BlockSpec((rt, _LANES), in_map),
                pl.BlockSpec((rt, _LANES), in_map),
            ],
            out_specs=pl.BlockSpec((1, chunk, _LANES), lambda c, i: (c, 0, 0)),
        ),
        compiler_params=pltpu.CompilerParams(
            dimension_semantics=("parallel", "arbitrary"),
            vmem_limit_bytes=32 * 1024 * 1024,
        ),
    )(pred2d, tgt2d)

    # Tiny finalize: cross-lane sum of the per-split partials + divide by the
    # true element count.
    return partials.sum() / jnp.float32(n_elems)


if __name__ == "__main__":
    key = jax.random.PRNGKey(0)
    k1, k2 = jax.random.split(key)

    # Primary small case consistent with the module's forward (any matching shapes).
    pred = jax.random.normal(k1, (2, 4, 16, 16), dtype=jnp.float32)
    target = jax.random.normal(k2, (2, 4, 16, 16), dtype=jnp.float32)
    loss = joint_loss(pred, target)
    jax.block_until_ready(loss)
    ref = jnp.mean((pred - target) ** 2)
    assert jnp.allclose(loss, ref, rtol=1e-5, atol=1e-6), (loss, ref)

    # Ragged-rows case (rows not a multiple of the row tile -> in-kernel masking,
    # clamped trailing block, chunked inner loop).
    k3, k4 = jax.random.split(k1)
    p2 = jax.random.normal(k3, (2, 3, 50, 128), dtype=jnp.float32)
    t2 = jax.random.normal(k4, (2, 3, 50, 128), dtype=jnp.float32)
    l2 = joint_loss(p2, t2)
    jax.block_until_ready(l2)
    r2 = jnp.mean((p2 - t2) ** 2)
    assert jnp.allclose(l2, r2, rtol=1e-5, atol=1e-6), (l2, r2)

    # Non-lane-aligned element count (exercises the <=127-element zero pad path).
    k5, k6 = jax.random.split(k2)
    p3 = jax.random.normal(k5, (3, 5, 7, 11), dtype=jnp.float32)
    t3 = jax.random.normal(k6, (3, 5, 7, 11), dtype=jnp.float32)
    l3 = joint_loss(p3, t3)
    jax.block_until_ready(l3)
    r3 = jnp.mean((p3 - t3) ** 2)
    assert jnp.allclose(l3, r3, rtol=1e-5, atol=1e-6), (l3, r3)

    print("KERNEL_OK")
</pallas_src>

<mosaic_0001>
module attributes {stable_mosaic.version = 11 : i64} {
  func.func @kernel(%arg0: i32, %arg1: i32, %arg2: memref<16x128xf32, #tpu.memory_space<vmem>>, %arg3: memref<16x128xf32, #tpu.memory_space<vmem>>, %arg4: memref<1x16x128xf32, #tpu.memory_space<vmem>>) attributes {dimension_semantics = [#tpu.dimension_semantics<parallel>, #tpu.dimension_semantics<arbitrary>], iteration_bounds = array<i64: 2, 1>, scalar_prefetch = 0 : i64, scratch_operands = 0 : i64, tpu.core_type = #tpu.core_type<tc>, window_params = [{transform_indices = @transform_0, window_bounds = array<i64: 16, 128>}, {transform_indices = @transform_1, window_bounds = array<i64: 16, 128>}, {transform_indices = @transform_2, window_bounds = array<i64: 1, 16, 128>}]} {
    %c0_i32 = arith.constant 0 : i32
    %0 = arith.cmpi eq, %arg1, %c0_i32 : i32
    %1 = arith.extui %0 : i1 to i32
    %c0_i32_0 = arith.constant 0 : i32
    %2 = arith.cmpi ne, %1, %c0_i32_0 : i32
    scf.if %2 {
      %cst_13 = arith.constant 0.000000e+00 : f32
      %28 = vector.broadcast %cst_13 : f32 to vector<1x16x128xf32>
      %c0_14 = arith.constant 0 : index
      %c0_15 = arith.constant 0 : index
      %c0_16 = arith.constant 0 : index
      %29 = vector.load %arg4[%c0_14, %c0_15, %c0_16] : memref<1x16x128xf32, #tpu.memory_space<vmem>>, vector<1x16x128xf32>
      tpu.vector_store %arg4[%c0_14, %c0_15, %c0_16], %28 {strides = array<i32>} : memref<1x16x128xf32, #tpu.memory_space<vmem>>, vector<1x16x128xf32>,
    } else {
    }
    %c1_i32 = arith.constant 1 : i32
    %3 = arith.muli %arg0, %c1_i32 : i32
    %4 = arith.addi %3, %arg1 : i32
    %c16_i32 = arith.constant 16 : i32
    %5 = arith.muli %4, %c16_i32 : i32
    %6 = tpu.iota {dimensions = array<i32: 0>} : vector<16x128xi32>
    %cst = arith.constant 0.000000e+00 : f32
    %7 = vector.broadcast %cst : f32 to vector<16x128xf32>
    %c0_i32_1 = arith.constant 0 : i32
    %c16_i32_2 = arith.constant 16 : i32
    %8 = arith.muli %c0_i32_1, %c16_i32_2 : i32
    %9 = tpu.assume_multiple %8, 16 : i32
    %10 = arith.index_cast %9 : i32 to index
    %c0 = arith.constant 0 : index
    %11 = vector.load %arg2[%10, %c0] : memref<16x128xf32, #tpu.memory_space<vmem>>, vector<16x128xf32>
    %12 = arith.index_cast %9 : i32 to index
    %c0_3 = arith.constant 0 : index
    %13 = vector.load %arg3[%12, %c0_3] : memref<16x128xf32, #tpu.memory_space<vmem>>, vector<16x128xf32>
    %14 = arith.subf %11, %13 : vector<16x128xf32>
    %15 = arith.addi %5, %9 : i32
    %16 = vector.broadcast %15 : i32 to vector<16x128xi32>
    %17 = arith.addi %6, %16 : vector<16x128xi32>
    %c16_i32_4 = arith.constant 16 : i32
    %18 = vector.broadcast %c16_i32_4 : i32 to vector<16x128xi32>
    %19 = arith.cmpi slt, %17, %18 : vector<16x128xi32>
    %20 = arith.mulf %14, %14 : vector<16x128xf32>
    %cst_5 = arith.constant 0.000000e+00 : f32
    %21 = vector.broadcast %cst_5 : f32 to vector<16x128xf32>
    %22 = arith.select %19, %20, %21 : vector<16x128xi1>, vector<16x128xf32>
    %23 = arith.addf %7, %22 : vector<16x128xf32>
    %c1_i32_6 = arith.constant 1 : i32
    %c0_7 = arith.constant 0 : index
    %c0_8 = arith.constant 0 : index
    %c0_9 = arith.constant 0 : index
    %24 = vector.load %arg4[%c0_7, %c0_8, %c0_9] : memref<1x16x128xf32, #tpu.memory_space<vmem>>, vector<1x16x128xf32>
    %25 = vector.shape_cast %23 : vector<16x128xf32> to vector<1x16x128xf32>
    %26 = arith.addf %24, %25 : vector<1x16x128xf32>
    %c0_10 = arith.constant 0 : index
    %c0_11 = arith.constant 0 : index
    %c0_12 = arith.constant 0 : index
    %27 = vector.load %arg4[%c0_10, %c0_11, %c0_12] : memref<1x16x128xf32, #tpu.memory_space<vmem>>, vector<1x16x128xf32>
    tpu.vector_store %arg4[%c0_10, %c0_11, %c0_12], %26 {strides = array<i32>} : memref<1x16x128xf32, #tpu.memory_space<vmem>>, vector<1x16x128xf32>,
    return
  }
  func.func @transform_0(%arg0: i32, %arg1: i32) -> (i32, i32) {
    %c1_i32 = arith.constant 1 : i32
    %0 = arith.muli %arg0, %c1_i32 : i32
    %1 = arith.addi %0, %arg1 : i32
    %c0_i32 = arith.constant 0 : i32
    %2 = arith.minsi %1, %c0_i32 : i32
    %c0_i32_0 = arith.constant 0 : i32
    %c0_i32_1 = arith.constant 0 : i32
    return %2, %c0_i32_0 : i32, i32
  }
  func.func @transform_1(%arg0: i32, %arg1: i32) -> (i32, i32) {
    %c1_i32 = arith.constant 1 : i32
    %0 = arith.muli %arg0, %c1_i32 : i32
    %1 = arith.addi %0, %arg1 : i32
    %c0_i32 = arith.constant 0 : i32
    %2 = arith.minsi %1, %c0_i32 : i32
    %c0_i32_0 = arith.constant 0 : i32
    %c0_i32_1 = arith.constant 0 : i32
    return %2, %c0_i32_0 : i32, i32
  }
  func.func @transform_2(%arg0: i32, %arg1: i32) -> (i32, i32, i32) {
    %c0_i32 = arith.constant 0 : i32
    %c0_i32_0 = arith.constant 0 : i32
    %c0_i32_1 = arith.constant 0 : i32
    return %arg0, %c0_i32, %c0_i32_0 : i32, i32, i32
  }
}

</mosaic_0001>

<bundles_post_ra>
// kernel: tpu_custom_call.1
= control target key start
LH: loop header
LB: loop body
LE: loop exit
PB: predicated region body
PF: predicated region fallthrough
CT: control target
= control target key end

     0   :  { %7 = vsyncpa [#allocation3], 0  ;;  %s910_s0 = inlined_call_operand.hbm [shape: f32[16,128], index: 0, kind: input, shape index: {}]   ;;  %s911_s1 = inlined_call_operand.hbm [shape: f32[16,128], index: 1, kind: input, shape index: {}]   ;;  %s912_s2 = inlined_call_operand.hbm [shape: f32[2,16,128], index: 2, kind: output, shape index: {}]  }
   0x1   :  { %9 = vsyncpa [#allocation3 + $0x1], 0 }
   0x2   :  { %10 = vsyncpa [#allocation6], 0 }
   0x3   :  { %12 = vsyncpa [#allocation6 + $0x1], 0 }
   0x4   :  { %13 = vsyncpa [#allocation4], 0 }
   0x5   :  { %15 = vsyncpa [#allocation4 + $0x1], 0  ;;  %s703_s9 = smov 0   ;;  %s705_s10 = smov 0  }
   0x6   :  { %s707_s11 = smov 0   ;;  %s709_s12 = smov 0  }
   0x7   :  { %s711_s13 = smov 0   ;;  %s713_s14 = smov 0  }
   0x8   :  { %s715_s15 = smov 0   ;;  %s717_s16 = smov 0  }
   0x9 LB: > { %s393_s17 = sadd.s32 4294967295, %s679_s16   ;;  %s394_s18 = sadd.s32 4294967294, %s679_s16   ;;  %s679_s16 = sphi %s717_s16, %s21_s16   ;;  %s675_s15 = sphi %s715_s15, %s931_s15   ;;  %s671_s14 = sphi %s713_s14, %s930_s14   ;;  %s667_s13 = sphi %s711_s13, %s900_s13   ;;  %s663_s12 = sphi %s709_s12, %s929_s12   ;;  %s659_s11 = sphi %s707_s11, %s928_s11   ;;  %s655_s10 = sphi %s705_s10, %s927_s10   ;;  %s651_s9 = sphi %s703_s9, %s926_s9  }
   0xa   : > { %s33_s19 = sadd.s32 1, %s675_s15  ;;  %p648_p1 = scmp.ne.s32.totalorder %s667_s13, 0 }
   0xb   : > { %p35_p0 = scmp.ge.s32.totalorder %s33_s19, 2  ;;  %p54_p2 = scmp.eq.s32.totalorder %s679_s16, 0 }
   0xc   : > { %p59_p3 = scmp.ne.s32.totalorder %s667_s13, %s663_s12  ;;  %p60_p5 = scmp.eq.s32.totalorder %s393_s17, 0 }
   0xd   : > { %s933_s19 = smov (%p35_p0, %s33_s19), 0  ;;  %p749_p4 = por %p648_p1, %p54_p2 }
   0xe   : > { %p753_p6 = por %p60_p5, %p59_p3  ;;  %s101_s22 = ssub.s32 %s675_s15, %s933_s19 }
   0xf   : > { %p102_p7 = scmp.eq.s32.totalorder %s101_s22, 0  ;;  %s104_s23 = sadd.s32 1, %s659_s11 }
  0x10   : > { %s916_s21 = scalar_select %p753_p6, 1, 0 }
  0x11   : > { %s761_s24 = scalar_select %p102_p7, %s659_s11, %s104_s23  }
  0x12   : > { %p114_p8 = scmp.ne.s32.totalorder %s659_s11, %s655_s10  ;;  %p115_p9 = scmp.eq.s32.totalorder %s393_s17, 1 }
  0x13   : > { %p120_p10 = scmp.ne.s32.totalorder %s655_s10, %s651_s9  ;;  %p121_p11 = scmp.eq.s32.totalorder %s394_s18, 1 }
  0x14   : > { %p767_p12 = por %p115_p9, %p114_p8  ;;  %p433_p1 = scmp.lt.s32.totalorder %s679_s16, 2 }
  0x15   : > { %p772_p0 = por %p121_p11, %p120_p10  ;;  %s681_s27 = smov [#allocation2]  }
  0x16   : > { %s917_s25 = scalar_select %p767_p12, 1, 0 }
  0x17   : > { %s918_s26 = scalar_select %p772_p0, 1, 0 }
  0x18   : > { %s155_s28 = sshll.u32 %s681_s27, 4  ;;  %p779_p2 = pnand %p433_p1, %p749_p4  ;;  %s156_s28 = int_to_ptr.vmem [resolvable:$true] %s155_s28 }
  0x19   : > { %s512_s4 = scalar_lea.hbm %s910_s0, 256 }
  0x1a   : > { %p513_p3 = scmp.ne.s32.totalorder %s910_s0, %s512_s4  ;;  %p514_p5 = pneg %p779_p2 }
  0x1b   : > { %p519_p8 = scmp.lt.u32.totalorder %s512_s4, %s512_s4  ;;  %p521_p9 = scmp.lt.u32.totalorder %s512_s4, %s910_s0 }
  0x1c   : > { %p515_p7 = pnand %p514_p5, %p513_p3 }
  0x1d   : > { %p522_p10 = por %p521_p9, %p519_p8 }
  0x1e   : > { %p516_p4 = pneg %p515_p7 }
  0x20   : > { %p523_p11 = pnand %p522_p10, %p516_p4 }
  0x22   : > { %526 = shalt.err (!%p523_p11)
}
  0x23   : > { %s527_s12 = scalar_lea.vmem %s156_s28, 256  ;;  %s534_s17 = scalar_lea.vmem %s156_s28, 512 }
  0x24   : > { %p528_p1 = scmp.ne.s32.totalorder %s156_s28, %s527_s12  ;;  %p535_p12 = scmp.lt.s32.totalorder %s156_s28, %s156_s28 }
  0x25   : > { %p536_p6 = scmp.lt.s32.totalorder %s534_s17, %s527_s12 }
  0x26   : > { %p530_p13 = pnand %p528_p1, %p514_p5 }
  0x27   : > { %p537_p3 = por %p536_p6, %p535_p12 }
  0x28   : > { %p531_p0 = pneg %p530_p13 }
  0x2a   : > { %p538_p7 = pnand %p537_p3, %p531_p0 }
  0x2c   : > { %541 = shalt.err (!%p538_p7)
}
  0x2d   : > { %s682_s18 = smov 128   ;;  %s683_s20 = smov 8  }
  0x2e   : > { %425 = dma.hbm_to_vmem [thread:$0]  (!%p779_p2), %s910_s0, 256, %s156_s28, [#allocation3], %s682_s18, %s682_s18, %s683_s20  }
  0x2f   : > { %p403_p13 = scmp.ge.s32.totalorder %s679_s16, 1  ;;  %p187_p4 = scmp.lt.s32.totalorder %s679_s16, 3 }
  0x30   : > { %s684_s30 = smov [#allocation5]   ;;  %s542_s6 = scalar_lea.hbm %s911_s1, 256 }
  0x31   : > { %p810_p8 = pnand %p403_p13, %p187_p4  ;;  %s179_s3 = sshll.u32 %s684_s30, 4  ;;  %s180_s3 = int_to_ptr.vmem [resolvable:$true] %s179_s3 }
  0x32   : > { %p543_p6 = scmp.ne.s32.totalorder %s911_s1, %s542_s6  ;;  %p549_p9 = scmp.lt.u32.totalorder %s542_s6, %s542_s6 }
  0x33   : > { %s920_s27 = scalar_select %p810_p8, 1, 0 }
  0x34   : > { %p545_p12 = pnand %p543_p6, %p514_p5  ;;  %p551_p10 = scmp.lt.u32.totalorder %s542_s6, %s911_s1 }
  0x36   : > { %p546_p0 = pneg %p545_p12  ;;  %p552_p11 = por %p551_p10, %p549_p9 }
  0x38   : > { %p553_p1 = pnand %p552_p11, %p546_p0 }
  0x3a   : > { %556 = shalt.err (!%p553_p1)
}
  0x3b   : > { %s557_s17 = scalar_lea.vmem %s180_s3, 256  ;;  %s564_s22 = scalar_lea.vmem %s180_s3, 512 }
  0x3c   : > { %p558_p3 = scmp.ne.s32.totalorder %s180_s3, %s557_s17  ;;  %p565_p4 = scmp.lt.s32.totalorder %s180_s3, %s180_s3 }
  0x3d   : > { %p566_p8 = scmp.lt.s32.totalorder %s564_s22, %s557_s17 }
  0x3e   : > { %p560_p7 = pnand %p558_p3, %p514_p5 }
  0x3f   : > { %p567_p6 = por %p566_p8, %p565_p4 }
  0x40   : > { %p561_p13 = pneg %p560_p7 }
  0x42   : > { %p568_p12 = pnand %p567_p6, %p561_p13 }
  0x44   : > { %571 = shalt.err (!%p568_p12)
}
  0x45   : > { %428 = dma.hbm_to_vmem [thread:$0]  (!%p779_p2), %s911_s1, 256, %s180_s3, [#allocation6], %s682_s18, %s682_s18, %s683_s20  }
  0x46   : > { %p921_p0 = scmp.ne.s32.totalorder %s920_s27, 0 }
  0x47   : > { %s193_s4 = sand.u32 (!%p921_p0), 1, %s667_s13   ;;  %p922_p5 = scmp.ne.s32.totalorder (!%p921_p0), %s916_s21, 0 }
  0x48   : > { %191 = sbr.rel (%p921_p0) target bundleno = 110 (0x6e), region = 28  ;;  %s404_s5 = sshll.u32 (!%p921_p0), %s193_s4, 4 }
  0x49   : > { %s194_s6 = scalar_lea.sflag (!%p921_p0), [#allocation3], %s193_s4  ;;  %s197_s7 = scalar_lea.vmem (!%p921_p0), [#allocation2], %s404_s5 }
  0x4f   : > { %637 = dma.done.wait (%p922_p5), %s194_s6, 256  }
  0x50   : > { %639 = vsyncadd (%p922_p5), %s194_s6, 4294967040  ;;  %s203_s29 = scalar_lea.sflag [#allocation6], %s193_s4  ;;  %s206_s8 = scalar_lea.vmem [#allocation5], %s404_s5 }
  0x51   : > { %641 = dma.done.wait (%p922_p5), %s203_s29, 256  }
  0x52   : > { %643 = vsyncadd (%p922_p5), %s203_s29, 4294967040  ;;  %s407_s18 = sshll.u32 %s671_s14, 4  ;;  %v248_v0 = vlaneseq  ;;  %s229_s20 = sand.u32 1, %s655_s10   ;;  %v251_v6 = vld [vmem:[%s197_s7] sm:$0xff]  ;;  %v252_v8 = vld [vmem:[%s197_s7 + $0x8] sm:$0xff] }
  0x53   : > { %v258_v2 = vstv %s407_s18  ;;  %s406_s27 = sshll.u32 %s229_s20, 4  ;;  %v253_v7 = vld [vmem:[%s206_s8] sm:$0xff]  ;;  %v254_v10 = vld [vmem:[%s206_s8 + $0x8] sm:$0xff]  ;;  %s415_s21 = sshll.u32 %s671_s14, 8 }
  0x54   : > { %v249_v1 = vshrl.u32 %v248_v0, 7  ;;  %v255_v9 = vsub.f32 %v251_v6, %v253_v7  ;;  %v256_v11 = vsub.f32 %v252_v8, %v254_v10  ;;  %s231_s3 = scalar_lea.vmem [#allocation7], %s406_s27  ;;  %s854_s22 = scalar_lea.hbm %s912_s2, %s415_s21 }
  0x55   : > { %s289_s28 = sshll.u32 %s231_s3, 4  ;;  %s858_s23 = scalar_lea.sflag [#allocation4], %s229_s20  ;;  %s856_s28 = int_to_ptr.vmem [resolvable:$true] %s289_s28 }
  0x56   : > { %v250_v3 = vadd.s32 8, %v249_v1  ;;  %v259_v4 = vadd.s32 %v258_v2, %v249_v1  ;;  %v263_v12 = vmul.f32 %v255_v9, %v255_v9  ;;  %v264_v13 = vmul.f32 %v256_v11, %v256_v11  ;;  %s572_s14 = scalar_lea.vmem %s856_s28, 256  ;;  %p923_p8 = scmp.ne.s32.totalorder %s917_s25, 0 }
  0x57   : > { %p573_p2 = scmp.ne.s32.totalorder %s856_s28, %s572_s14  ;;  %s685_s30 = smov [#allocation7]  }
  0x58   : > { %v260_v5 = vadd.s32 %v258_v2, %v250_v3  ;;  %vm261_vm0 = vcmp.lt.s32.totalorder %v259_v4, 16  ;;  %s576_s4 = sshll.u32 %s685_s30, 4  ;;  %s577_s4 = int_to_ptr.vmem [resolvable:$false] %s576_s4 }
  0x59   : > { %v265_v14 = vsel %vm261_vm0, %v263_v12, 0.0  ;;  %p574_p9 = pnand %p573_p2, %p923_p8  ;;  %s578_s5 = scalar_lea.vmem %s577_s4, 512 }
  0x5a   : > { %vm262_vm1 = vcmp.lt.s32.totalorder %v260_v5, 16  ;;  %273 = vst [vmem:[%s231_s3] sm:$0xff] %v265_v14  ;;  %p579_p11 = scmp.lt.s32.totalorder %s856_s28, %s577_s4  ;;  %p580_p1 = scmp.lt.s32.totalorder %s578_s5, %s572_s14 }
  0x5b   : > { %v266_v15 = vsel %vm262_vm1, %v264_v13, 0.0  ;;  %p575_p10 = pneg %p574_p9 }
  0x5c   : > { %274 = vst [vmem:[%s231_s3 + $0x8] sm:$0xff] %v266_v15  ;;  %p581_p3 = por %p580_p1, %p579_p11 }
  0x5e   : > { %p582_p7 = pnand %p581_p3, %p575_p10 }
  0x60   : > { %585 = shalt.err (!%p582_p7)
}
  0x61   : > { %s586_s6 = scalar_lea.hbm %s854_s22, 256  ;;  %s590_s8 = scalar_lea.hbm %s912_s2, 512 }
  0x62   : > { %p587_p13 = scmp.ne.s32.totalorder %s854_s22, %s586_s6  ;;  %p591_p12 = scmp.lt.u32.totalorder %s854_s22, %s912_s2 }
  0x63   : > { %p592_p0 = scmp.lt.u32.totalorder %s590_s8, %s586_s6  ;;  %p594_p2 = scmp.lt.u32.totalorder %s586_s6, %s854_s22 }
  0x64   : > { %p588_p4 = pnand %p587_p13, %p923_p8 }
  0x65   : > { %p593_p5 = por %p592_p0, %p591_p12 }
  0x66   : > { %p589_p6 = pneg %p588_p4 }
  0x67   : > { %p595_p9 = por %p594_p2, %p593_p5 }
  0x69   : > { %p596_p10 = pnand %p595_p9, %p589_p6 }
  0x6b   : > { %599 = shalt.err (!%p596_p10)
}
  0x6c   : > { %s686_s27 = smov 128   ;;  %s687_s21 = smov 8  }
  0x6d   : > { %420 = dma.vmem_to_hbm [thread:$0]  (%p923_p8), %s856_s28, 256, %s854_s22, %s858_s23, %s686_s27, %s686_s27, %s687_s21  }
  0x6e PF: > { %s304_s3 = sand.u32 1, %s651_s9   ;;  %p924_p11 = scmp.ne.s32.totalorder %s918_s26, 0 }
  0x6f   : > { %p925_p1 = scmp.ge.s32.totalorder %s679_s16, 2  ;;  %s305_s12 = scalar_lea.sflag [#allocation4], %s304_s3 }
  0x71   : > { %p430_p3 = pnand %p925_p1, %p924_p11 }
  0x73   : > { %645 = dma.done.wait (!%p430_p3), %s305_s12, 256  }
  0x74   : > { %647 = vsyncadd (!%p430_p3), %s305_s12, 4294967040  ;;  %s21_s16 = sadd.s32 1, %s679_s16   ;;  %s926_s9 = smov %s655_s10 }
  0x75   : > { %p18_p7 = scmp.ge.s32.totalorder %s21_s16, 4   ;;  %s927_s10 = smov %s659_s11 }
  0x76   : > { %s928_s11 = smov %s761_s24  ;;  %s929_s12 = smov %s667_s13 }
  0x77   : > { %s900_s13 = smov 0   ;;  %s930_s14 = smov %s675_s15 }
  0x78   : > { %s931_s15 = smov %s933_s19  ;;  %20 = sbr.rel (!%p18_p7) target bundleno = 9 (0x9), region = 90 }
  0x7f   :  { %310 = vsyncpa [#allocation3], 1 }
  0x80   :  { %312 = vsyncpa [#allocation3 + $0x1], 1 }
  0x81   :  { %313 = vsyncpa [#allocation6], 1 }
  0x82   :  { %315 = vsyncpa [#allocation6 + $0x1], 1 }
  0x83   :  { %316 = vsyncpa [#allocation4], 1 }
  0x84   :  { %318 = vsyncpa [#allocation4 + $0x1], 1 }

</bundles_post_ra>
